<compile_context>
chip_gen: v7x
topology: tpu7x:2x2x1
jax: 0.10.0
libtpu: 0.0.40
codegen_flags: <defaults>
</compile_context>

<pallas_src>
import jax
import jax.numpy as jnp
from jax.experimental import pallas as pl
from jax.experimental.pallas import tpu as pltpu

LANE = 128      # TPU lane width: last dim of every block.
TM_MAX = 2048   # rows per grid block: (2048, 128) f32 = 1 MiB per input buffer.


def _elem_loss(x, gan_type, t):
    """Per-element GAN loss in f32; `t` is a Python-time constant."""
    if gan_type in ("gan", "ragan"):
        # BCEWithLogitsLoss == softplus(x) - t*x, numerically stable form:
        #   max(x,0) + log1p(exp(-|x|)) - t*x
        e = jnp.maximum(x, 0.0) + jnp.log1p(jnp.exp(-jnp.abs(x)))
        if t != 0.0:
            e = e - x * t
        return e
    if gan_type == "lsgan":
        d = x - t if t != 0.0 else x
        return d * d
    if gan_type == "wgan-gp":
        # t encodes the sign: -1.0 if target_is_real else +1.0.
        return x * t
    raise NotImplementedError(gan_type)


def _make_partial_sum_kernel(gan_type, t_val, tm, rows_valid, n_blocks):
    """Each grid block writes a (1, 1, LANE) f32 partial sum of its tile."""
    t = float(t_val)
    needs_row_mask = (rows_valid % tm) != 0

    def kernel(x_ref, o_ref):
        i = pl.program_id(0)
        x = x_ref[...].astype(jnp.float32)
        # TODO(synk): on v6e/v7x with bf16 logits the gan/ragan softplus could
        # run at bf16 (native bf16 EUP) to relieve the transcendental slot;
        # kept f32 here for accuracy and v5e portability.
        elem = _elem_loss(x, gan_type, t)

        def write(e):
            o_ref[...] = jnp.sum(e, axis=0, keepdims=True).reshape(1, 1, LANE)

        if needs_row_mask:
            # Only the last block can contain Pallas boundary-padded rows.
            @pl.when(i < n_blocks - 1)
            def _interior():
                write(elem)

            @pl.when(i == n_blocks - 1)
            def _tail():
                row = jax.lax.broadcasted_iota(jnp.int32, (tm, LANE), 0) + i * tm
                # Keep this a select (not a multiply-by-mask) so NaN/Inf from
                # the unspecified boundary padding is discarded.
                write(jnp.where(row < rows_valid, elem, 0.0))
        else:
            write(elem)

    return kernel


def gan_loss(x, target_is_real, gan_type="gan",
             real_label_val=1.0, fake_label_val=0.0):
    """Pallas equivalent of GANLoss(gan_type, ...).forward(x, target_is_real)."""
    gan_type = gan_type.lower()

    # get_target_label semantics, baked in as a Python constant.
    if gan_type == "wgan-gp":
        t_val = -1.0 if target_is_real else 1.0
    elif gan_type in ("gan", "ragan", "lsgan"):
        t_val = float(real_label_val) if target_is_real else float(fake_label_val)
    else:
        raise NotImplementedError(f"GAN type [{gan_type}] is not found")

    n_valid = int(x.size)
    xf = x.reshape(-1)                      # contiguous flatten, native dtype
    rows_full = n_valid // LANE
    tail_n = n_valid - rows_full * LANE

    if rows_full == 0:
        # Too small for a single lane-dense row; a kernel launch is pure
        # overhead, let XLA fuse it.  (Callers with tiny patch-GAN outputs may
        # want to raise this threshold.)
        return jnp.sum(_elem_loss(xf.astype(jnp.float32), gan_type, t_val)) \
            / jnp.float32(n_valid)

    tail_sum = jnp.zeros((), jnp.float32)
    if tail_n:
        # Ragged (<128-element) tail handled in plain JAX so the kernel input
        # stays an exact (rows_full, 128) slab (no whole-array pad+concat copy).
        tail = xf[rows_full * LANE:]
        tail_sum = jnp.sum(_elem_loss(tail.astype(jnp.float32), gan_type, t_val))
        xf = xf[: rows_full * LANE]
        # TODO(synk): XLA may still materialize this prefix slice for the
        # custom-call operand; a fully copy-free ragged path would need a
        # manual-DMA kernel over the original flat HBM ref (memory_space=pl.ANY).

    x2 = xf.reshape(rows_full, LANE)

    if rows_full <= TM_MAX:
        tm, n_blocks = rows_full, 1         # single block == full array extent
    else:
        tm = TM_MAX                         # multiple of 8 (f32) and 16 (bf16)
        n_blocks = (rows_full + tm - 1) // tm

    kernel = _make_partial_sum_kernel(gan_type, t_val, tm, rows_full, n_blocks)

    in_spec = pl.BlockSpec((tm, LANE), lambda i: (i, 0))
    if n_blocks >= 3:
        try:  # deeper input buffering on long grids to keep DMA hidden
            in_spec = pl.BlockSpec((tm, LANE), lambda i: (i, 0),
                                   pipeline_mode=pl.Buffered(3))
        except (AttributeError, TypeError):
            pass  # older pallas: fall back to default double-buffering

    partials = pl.pallas_call(
        kernel,
        out_shape=jax.ShapeDtypeStruct((n_blocks, 1, LANE), jnp.float32),
        grid=(n_blocks,),
        in_specs=[in_spec],
        out_specs=pl.BlockSpec((1, 1, LANE), lambda i: (i, 0, 0)),
        compiler_params=pltpu.CompilerParams(
            dimension_semantics=("parallel",)),  # independent blocks; v7x uses both TCs
    )(x2)

    # Tiny cross-block reduction + mean normalization in plain JAX.
    return (jnp.sum(partials) + tail_sum) / jnp.float32(n_valid)


def _reference(x, target_is_real, gan_type, real_label_val=1.0, fake_label_val=0.0):
    """Pure-JAX reference mirroring the PyTorch module."""
    x = x.astype(jnp.float32)
    if gan_type == "wgan-gp":
        return -jnp.mean(x) if target_is_real else jnp.mean(x)
    t = jnp.full_like(x, real_label_val if target_is_real else fake_label_val)
    if gan_type in ("gan", "ragan"):
        elem = jnp.maximum(x, 0.0) - x * t + jnp.log1p(jnp.exp(-jnp.abs(x)))
        return jnp.mean(elem)
    elif gan_type == "lsgan":
        return jnp.mean((x - t) ** 2)
    raise NotImplementedError(gan_type)


if __name__ == "__main__":
    key = jax.random.PRNGKey(0)
    k1, k2, k3 = jax.random.split(key, 3)
    # Discriminator logits, NCHW like the PyTorch caller would pass.
    x_main = jax.random.normal(k1, (2, 4, 16, 16), dtype=jnp.float32)
    # Odd-sized logits: exercises the ragged (<128) JAX-tail path.
    x_odd = jax.random.normal(k2, (2, 3, 7, 5), dtype=jnp.float32)
    # Medium input: exercises the multi-block grid + masked last row-block path.
    x_med = jax.random.normal(k3, (2, 4, 260, 128), dtype=jnp.float32)

    ok = True
    for x in (x_main, x_odd, x_med):
        for gt in ("gan", "ragan", "lsgan", "wgan-gp"):
            for target_is_real in (True, False):
                got = jax.block_until_ready(gan_loss(x, target_is_real, gt))
                want = _reference(x, target_is_real, gt)
                if not jnp.allclose(got, want, rtol=1e-4, atol=1e-6):
                    ok = False
                    print(f"MISMATCH {gt} real={target_is_real} "
                          f"shape={tuple(x.shape)}: {got} vs {want}")

    if ok:
        print("KERNEL_OK")
</pallas_src>

<mosaic_0001>
module attributes {stable_mosaic.version = 11 : i64} {
  func.func @kernel(%arg0: i32, %arg1: memref<16x128xf32, #tpu.memory_space<vmem>>, %arg2: memref<1x1x128xf32, #tpu.memory_space<vmem>>) attributes {dimension_semantics = [#tpu.dimension_semantics<parallel>], iteration_bounds = array<i64: 1>, scalar_prefetch = 0 : i64, scratch_operands = 0 : i64, tpu.core_type = #tpu.core_type<tc>, window_params = [{transform_indices = @transform_0, window_bounds = array<i64: 16, 128>}, {transform_indices = @transform_1, window_bounds = array<i64: 1, 1, 128>}]} {
    %c0 = arith.constant 0 : index
    %c0_0 = arith.constant 0 : index
    %0 = vector.load %arg1[%c0, %c0_0] : memref<16x128xf32, #tpu.memory_space<vmem>>, vector<16x128xf32>
    %cst = arith.constant 0.000000e+00 : f32
    %1 = vector.broadcast %cst : f32 to vector<16x128xf32>
    %2 = arith.maximumf %0, %1 : vector<16x128xf32>
    %3 = math.absf %0 : vector<16x128xf32>
    %cst_1 = arith.constant 0.000000e+00 : f32
    %4 = vector.broadcast %cst_1 : f32 to vector<16x128xf32>
    %5 = arith.subf %4, %3 : vector<16x128xf32>
    %6 = math.exp %5 : vector<16x128xf32>
    %7 = math.log1p %6 : vector<16x128xf32>
    %8 = arith.addf %2, %7 : vector<16x128xf32>
    %cst_2 = arith.constant 1.000000e+00 : f32
    %9 = vector.broadcast %cst_2 : f32 to vector<16x128xf32>
    %10 = arith.mulf %0, %9 : vector<16x128xf32>
    %11 = arith.subf %8, %10 : vector<16x128xf32>
    %cst_3 = arith.constant dense<0.000000e+00> : vector<128xf32>
    %12 = vector.multi_reduction <add>, %11, %cst_3 [0] : vector<16x128xf32> to vector<128xf32>
    %13 = vector.shape_cast %12 : vector<128xf32> to vector<1x128xf32>
    %14 = vector.shape_cast %13 : vector<1x128xf32> to vector<1x1x128xf32>
    %c0_4 = arith.constant 0 : index
    %c0_5 = arith.constant 0 : index
    %c0_6 = arith.constant 0 : index
    %15 = vector.load %arg2[%c0_4, %c0_5, %c0_6] : memref<1x1x128xf32, #tpu.memory_space<vmem>>, vector<1x1x128xf32>
    tpu.vector_store %arg2[%c0_4, %c0_5, %c0_6], %14 {strides = array<i32>} : memref<1x1x128xf32, #tpu.memory_space<vmem>>, vector<1x1x128xf32>,
    return
  }
  func.func @transform_0(%arg0: i32) -> (i32, i32) {
    %c0_i32 = arith.constant 0 : i32
    %c0_i32_0 = arith.constant 0 : i32
    return %arg0, %c0_i32 : i32, i32
  }
  func.func @transform_1(%arg0: i32) -> (i32, i32, i32) {
    %c0_i32 = arith.constant 0 : i32
    %c0_i32_0 = arith.constant 0 : i32
    %c0_i32_1 = arith.constant 0 : i32
    return %arg0, %c0_i32, %c0_i32_0 : i32, i32, i32
  }
}

</mosaic_0001>

<bundles_post_ra>
// kernel: tpu_custom_call.1
= control target key start
LH: loop header
LB: loop body
LE: loop exit
PB: predicated region body
PF: predicated region fallthrough
CT: control target
= control target key end

     0   :  { %6 = vsyncpa [#allocation3], 0  ;;  %s178_s0 = inlined_call_operand.hbm [shape: f32[16,128], index: 0, kind: input, shape index: {}]   ;;  %s179_s1 = inlined_call_operand.hbm [shape: f32[1,1,128], index: 1, kind: output, shape index: {}]  }
   0x1   :  { %7 = vsyncpa [#allocation4], 0  ;;  %s140_s6 = smov [#allocation2]   ;;  %s92_s10 = scalar_lea.hbm %s178_s0, 256 }
   0x2   :  { %s13_s7 = sshll.u32 %s140_s6, 4  ;;  %p93_p0 = scmp.ne.s32.totalorder %s178_s0, %s92_s10  ;;  %s14_s7 = int_to_ptr.vmem [resolvable:$true] %s13_s7 }
   0x3   :  { %p96_p1 = scmp.lt.u32.totalorder %s92_s10, %s178_s0 }
   0x5   :  { %p98_p2 = pnand %p96_p1, %p93_p0 }
   0x7   :  { %101 = shalt.err (!%p98_p2)
}
   0x8   :  { %s102_s15 = scalar_lea.vmem %s14_s7, 256  ;;  %p107_p4 = scmp.lt.s32.totalorder %s14_s7, %s14_s7 }
   0x9   :  { %p103_p3 = scmp.ne.s32.totalorder %s14_s7, %s102_s15  ;;  %p108_p5 = scmp.lt.s32.totalorder %s102_s15, %s102_s15 }
   0xb   :  { %p109_p6 = por %p108_p5, %p107_p4 }
   0xd   :  { %p110_p7 = pnand %p109_p6, %p103_p3 }
   0xf   :  { %113 = shalt.err (!%p110_p7)
}
  0x10   :  { %s141_s16 = smov 128   ;;  %s142_s17 = smov 8  }
  0x11   :  { %19 = dma.hbm_to_vmem [thread:$0]  %s178_s0, 256, %s14_s7, [#allocation3], %s141_s16, %s141_s16, %s142_s17  }
  0x12   :  { %136 = dma.done.wait [#allocation3], 256  }
  0x13   :  { %137 = vsyncadd [#allocation3], 4294967040  ;;  %v23_v0 = vld [vmem:[#allocation2] sm:$0xff]  ;;  %v24_v1 = vld [vmem:[#allocation2 + $0x8] sm:$0xff]  ;;  %s143_s0 = smov [#allocation5]  }
  0x14   :  { %v27_v2 = vand.u32 2147483647, %v23_v0  ;;  %v28_v3 = vand.u32 2147483647, %v24_v1  ;;  %v25_v20 = vmax.f32 %v23_v0, 0.0  ;;  %v26_v23 = vmax.f32 %v24_v1, 0.0 }
  0x15   :  { %s71_s20 = sshll.u32 %s143_s0, 4  ;;  %s72_s20 = int_to_ptr.vmem [resolvable:$true] %s71_s20 }
  0x16   :  { %v29_v4 = vsub.f32 0.0, %v27_v2  ;;  %v30_v5 = vsub.f32 0.0, %v28_v3  ;;  %s114_s21 = scalar_lea.vmem %s72_s20, 16  ;;  %s118_s22 = scalar_lea.vmem %s72_s20, 32 }
  0x17   :  { %p115_p8 = scmp.ne.s32.totalorder %s72_s20, %s114_s21  ;;  %p119_p9 = scmp.lt.s32.totalorder %s72_s20, %s72_s20 }
  0x18   :  { %v31_v6 = vmul.f32 1.442695, %v29_v4  ;;  %v33_v7 = vmul.f32 1.442695, %v30_v5  ;;  %p120_p10 = scmp.lt.s32.totalorder %s118_s22, %s114_s21 }
  0x1a   :  { %84 = vpow2.f32 %v31_v6  ;;  %p121_p11 = por %p120_p10, %p119_p9 }
  0x1b   :  { %86 = vpow2.f32 %v33_v7 }
  0x1c   :  { %p122_p12 = pnand %p121_p11, %p115_p8 }
  0x24   :  { %v85_v8 = vpop.eup %84 }
  0x25   :  { %v87_v9 = vpop.eup %86  ;;  %v35_v10 = vadd.f32 1.0, %v85_v8  ;;  %v38_v12 = vmul.f32 -0.5, %v85_v8  ;;  %v41_v15 = vand.u32 2147483647, %v85_v8 }
  0x26   :  { %v44_v11 = vadd.f32 1.0, %v87_v9  ;;  %v47_v13 = vmul.f32 -0.5, %v87_v9  ;;  %v50_v17 = vand.u32 2147483647, %v87_v9 }
  0x27   :  { %88 = vlog2.f32 %v35_v10  ;;  %v39_v14 = vadd.f32 1.0, %v38_v12  ;;  %vm42_vm0 = vcmp.lt.f32.partialorder %v41_v15, 0.0004427343 }
  0x28   :  { %90 = vlog2.f32 %v44_v11  ;;  %v48_v16 = vadd.f32 1.0, %v47_v13  ;;  %vm51_vm1 = vcmp.lt.f32.partialorder %v50_v17, 0.0004427343 }
  0x29   :  { %v40_v18 = vmul.f32 %v85_v8, %v39_v14 }
  0x2a   :  { %v49_v21 = vmul.f32 %v87_v9, %v48_v16 }
  0x31   :  { %v89_v19 = vpop.eup %88 }
  0x32   :  { %v91_v22 = vpop.eup %90  ;;  %v37_v24 = vmul.f32 0.6931472, %v89_v19 }
  0x33   :  { %v46_v25 = vmul.f32 0.6931472, %v91_v22 }
  0x34   :  { %v43_v26 = vsel %vm42_vm0, %v40_v18, %v37_v24 }
  0x35   :  { %v52_v27 = vsel %vm51_vm1, %v49_v21, %v46_v25  ;;  %v53_v28 = vadd.f32 %v43_v26, %v25_v20 }
  0x36   :  { %v54_v29 = vadd.f32 %v52_v27, %v26_v23 }
  0x37   :  { %v55_v30 = vsub.f32 %v53_v28, %v23_v0 }
  0x38   :  { %v56_v31 = vsub.f32 %v54_v29, %v24_v1 }
  0x3a   :  { %v57_v32 = vadd.f32 %v56_v31, %v55_v30 }
  0x3c   :  { %v58_v33 = vrot.slane %v57_v32, 4 }
  0x3e   :  { %v59_v34 = vadd.f32 %v58_v33, %v57_v32 }
  0x40   :  { %v60_v35 = vrot.slane %v59_v34, 2 }
  0x42   :  { %v61_v36 = vadd.f32 %v60_v35, %v59_v34 }
  0x44   :  { %v62_v37 = vrot.slane %v61_v36, 1 }
  0x46   :  { %v63_v38 = vadd.f32 %v62_v37, %v61_v36 }
  0x48   :  { %64 = vst [vmem:[#allocation5] sm:$0x1] %v63_v38 }
  0x49   :  { %125 = shalt.err (!%p122_p12)
}
  0x4a   :  { %s126_s25 = scalar_lea.hbm %s179_s1, 16 }
  0x4b   :  { %p127_p13 = scmp.ne.s32.totalorder %s179_s1, %s126_s25  ;;  %p130_p0 = scmp.lt.u32.totalorder %s126_s25, %s179_s1 }
  0x4d   :  { %p132_p1 = pnand %p130_p0, %p127_p13 }
  0x4f   :  { %135 = shalt.err (!%p132_p1)
}
  0x50   :  { %74 = dma.vmem_to_hbm [thread:$0]  %s72_s20, 16, %s179_s1, [#allocation4]  }
  0x51   :  { %138 = dma.done.wait [#allocation4], 16  }
  0x52   :  { %139 = vsyncadd [#allocation4], 4294967280 }
  0x53   :  { %78 = vsyncpa [#allocation3], 1 }
  0x54   :  { %79 = vsyncpa [#allocation4], 1 }

</bundles_post_ra>
